<compile_context>
chip_gen: v6e
topology: v6e:2x2x1
jax: 0.10.0
libtpu: 0.0.40
codegen_flags: <defaults>
</compile_context>

<pallas_src>
import jax
import jax.numpy as jnp
from jax.experimental import pallas as pl
from jax.experimental.pallas import tpu as pltpu  # noqa: F401  (kept for TPU-specific tweaks)

EPS = 1e-5

# ----- sizes -----
SEQ = 8
BATCH = 4
N_EMBED = 100          # vocab size
D_EMBED = 32
D_PROJ = 32
D_HIDDEN = 32
FEAT = 4 * D_HIDDEN    # 128
D_MLP = 64
D_OUT = 2
N_EXTRA = 7
LANES = 128

# ----- packed parameter-slab row offsets (all 8-row aligned) -----
R_WHH = 0                          # (32, 128)  W_hh (g-cols pre-scaled by 2)
R_W1F = R_WHH + D_HIDDEN           # 32  : (128, 64) W1 feature part (feature-BN folded)
R_W2 = R_W1F + FEAT                # 160 : (64, 64)  W2 (bn1 folded)
R_WO = R_W2 + D_MLP                # 224 : (64, 2)   W_out (bn2 folded)
R_B2 = R_WO + D_MLP                # 288 : (1, 64)   b2
R_BO = R_B2 + 8                    # 296 : (1, 2)    b_out
SLAB_ROWS = R_BO + 8               # 304


# ---------------------------------------------------------------------------
# Single fused kernel: LSTM recurrence (both sentences batched together) +
# feature concat + 2-layer MLP (BNs pre-folded) + output Linear + LogSoftmax.
# ---------------------------------------------------------------------------
def fused_kernel(xg_ref, slab_ref, h1b_ref, o_ref):
    H = D_HIDDEN

    # W_hh resident once, cast to bf16 (single-pass MXU matmul, f32 accumulate).
    whh = slab_ref[R_WHH:R_WHH + H, :].astype(jnp.bfloat16)          # (32, 128)

    h = None
    c = None
    # Fully unrolled static time loop (SEQ=8).
    for t in range(SEQ):
        if t == 0:
            # h0 = 0 -> no recurrence matmul; gate bias is pre-folded into xg.
            gates = xg_ref[0]                                        # (2B, 4H)
        else:
            gates = xg_ref[t] + jnp.dot(h.astype(jnp.bfloat16), whh,
                                        preferred_element_type=jnp.float32)
        # Single full-width sigmoid per step; g-gate pre-activations were scaled by 2
        # at fold time so tanh(x) = 2*sigmoid(2x) - 1 needs no extra transcendental.
        sg = jax.nn.sigmoid(gates)
        i = sg[:, 0 * H:1 * H]
        f = sg[:, 1 * H:2 * H]
        g = 2.0 * sg[:, 2 * H:3 * H] - 1.0
        o = sg[:, 3 * H:4 * H]
        c = i * g if t == 0 else f * c + i * g
        h = o * jnp.tanh(c)

    s1 = h[:BATCH]               # (B, H)  sentence1 final hidden state
    s2 = h[BATCH:]               # (B, H)  sentence2 final hidden state

    # Feature: cat([s1, s2, s1-s2, s1*s2], 1); feature-BN folded into W1_feat.
    feat = jnp.concatenate([s1, s2, s1 - s2, s1 * s2], axis=1)       # (B, 4H)

    # MLP layer 1: feat @ W1_feat + (extra @ W1_extra + b1)  [extra part precomputed].
    w1f = slab_ref[R_W1F:R_W1F + FEAT, 0:D_MLP]
    h1 = jnp.dot(feat, w1f, preferred_element_type=jnp.float32) + h1b_ref[...]
    h1 = jnp.maximum(h1, 0.0)

    # MLP layer 2 (+ ReLU); bn1 folded into W2/b2.
    w2 = slab_ref[R_W2:R_W2 + D_MLP, 0:D_MLP]
    b2 = slab_ref[R_B2:R_B2 + 1, 0:D_MLP]
    h2 = jnp.dot(h1, w2, preferred_element_type=jnp.float32) + b2
    h2 = jnp.maximum(h2, 0.0)

    # Output Linear (bn2 folded) + LogSoftmax.
    wo = slab_ref[R_WO:R_WO + D_MLP, 0:D_OUT]
    bo = slab_ref[R_BO:R_BO + 1, 0:D_OUT]
    logits = jnp.dot(h2, wo, preferred_element_type=jnp.float32) + bo
    m = jnp.max(logits, axis=-1, keepdims=True)
    lse = m + jnp.log(jnp.sum(jnp.exp(logits - m), axis=-1, keepdims=True))
    o_ref[...] = (logits - lse).astype(o_ref.dtype)


def fused_forward_call(xg, slab, h1_bias):
    # grid=(): every input is a full-array VMEM block; single kernel launch, 3 DMAs.
    return pl.pallas_call(
        fused_kernel,
        out_shape=jax.ShapeDtypeStruct((BATCH, D_OUT), jnp.float32),
    )(xg, slab, h1_bias)


# ---------------------------------------------------------------------------
# Glue (plain JAX): parameter init, eval-mode algebraic folding + slab packing,
# feature extraction, embedding-table gather, extra-feature matmul.
# ---------------------------------------------------------------------------
def sentence_features(sent1, sent2, pad_idx=1):
    # TODO(synk): original sentence_features() is not provided in the source;
    # using 7 simple deterministic length/overlap features as stand-ins.
    m1 = (sent1 != pad_idx).astype(jnp.float32)
    m2 = (sent2 != pad_idx).astype(jnp.float32)
    len1 = m1.sum(0)
    len2 = m2.sum(0)
    eq = (sent1[:, None, :] == sent2[None, :, :]) & (sent1[:, None, :] != pad_idx)
    overlap = eq.any(axis=1).astype(jnp.float32).sum(0)
    feats = jnp.stack(
        [len1, len2, jnp.abs(len1 - len2), len1 + len2,
         overlap,
         overlap / jnp.maximum(len1, 1.0),
         overlap / jnp.maximum(len2, 1.0)],
        axis=1)
    return feats.astype(jnp.float32)          # (B, 7)


def init_params(key):
    ks = jax.random.split(key, 16)

    def nrm(k, shape, s=0.1):
        return jax.random.normal(k, shape, jnp.float32) * s

    p = {}
    p["embed"] = nrm(ks[0], (N_EMBED, D_EMBED), 0.5)
    p["wp"] = nrm(ks[1], (D_EMBED, D_PROJ))
    p["bp"] = jnp.zeros((1, D_PROJ), jnp.float32)
    p["ebn_g"] = jnp.full((1, D_PROJ), 1.1, jnp.float32)
    p["ebn_b"] = jnp.full((1, D_PROJ), 0.05, jnp.float32)
    p["ebn_m"] = nrm(ks[2], (1, D_PROJ), 0.05)
    p["ebn_v"] = jnp.full((1, D_PROJ), 0.9, jnp.float32)
    # LSTM weights stored pre-transposed: (in, 4H); bias = b_ih + b_hh
    p["w_ih"] = nrm(ks[3], (D_PROJ, 4 * D_HIDDEN))
    p["w_hh"] = nrm(ks[4], (D_HIDDEN, 4 * D_HIDDEN))
    p["b_lstm"] = nrm(ks[5], (1, 4 * D_HIDDEN), 0.05)
    # Feature BN (over 4*H)
    p["fbn_g"] = jnp.ones((1, FEAT), jnp.float32)
    p["fbn_b"] = jnp.zeros((1, FEAT), jnp.float32)
    p["fbn_m"] = nrm(ks[6], (1, FEAT), 0.05)
    p["fbn_v"] = jnp.full((1, FEAT), 1.05, jnp.float32)
    # MLP layer 1 (Linear(4H+7, D_MLP) split into feat / extra parts)
    p["w1f"] = nrm(ks[7], (FEAT, D_MLP))
    p["w1e"] = nrm(ks[8], (N_EXTRA, D_MLP))
    p["b1"] = jnp.zeros((1, D_MLP), jnp.float32)
    p["bn1_g"] = jnp.ones((1, D_MLP), jnp.float32)
    p["bn1_b"] = jnp.zeros((1, D_MLP), jnp.float32)
    p["bn1_m"] = nrm(ks[9], (1, D_MLP), 0.05)
    p["bn1_v"] = jnp.ones((1, D_MLP), jnp.float32)
    # MLP layer 2
    p["w2"] = nrm(ks[10], (D_MLP, D_MLP))
    p["b2"] = jnp.zeros((1, D_MLP), jnp.float32)
    p["bn2_g"] = jnp.ones((1, D_MLP), jnp.float32)
    p["bn2_b"] = jnp.zeros((1, D_MLP), jnp.float32)
    p["bn2_m"] = nrm(ks[11], (1, D_MLP), 0.05)
    p["bn2_v"] = jnp.ones((1, D_MLP), jnp.float32)
    # Output layer
    p["wo"] = nrm(ks[12], (D_MLP, D_OUT))
    p["bo"] = jnp.zeros((1, D_OUT), jnp.float32)
    return p


def fold_params(p):
    """One-time eval-mode algebraic folding (exact) + parameter-slab packing.

    - proj Linear + embed BN(eval) + LSTM input matmul + LSTM gate bias ->
      E' = embed @ (Wp*s) @ W_ih + b'  (bias folded into every row).
    - tanh g-gate via 2*sigmoid(2x)-1: scale g columns of E' and W_hh by 2.
    - feature BN(eval) folded into W1_feat/b1, bn1 into W2/b2, bn2 into W_out/b_out.
    - W_hh + head weights/biases packed into one (304, 128) f32 slab.
    """
    H = D_HIDDEN

    # Embed -> proj -> BN -> LSTM-input chain, bias folded into the table.
    s_e = p["ebn_g"] * jax.lax.rsqrt(p["ebn_v"] + EPS)            # (1, D_PROJ)
    t_e = p["ebn_b"] - p["ebn_m"] * s_e
    wp_f = p["wp"] * s_e                                          # (D_EMBED, D_PROJ)
    bp_f = p["bp"] * s_e + t_e                                    # (1, D_PROJ)
    b_gates = bp_f @ p["w_ih"] + p["b_lstm"]                      # (1, 4H)
    emb_gates = (p["embed"] @ wp_f) @ p["w_ih"] + b_gates         # (N_EMBED, 4H)

    # Scale g-gate columns by 2 (tanh(x) = 2*sigmoid(2x) - 1).
    gscale = jnp.concatenate(
        [jnp.ones((1, 2 * H), jnp.float32),
         jnp.full((1, H), 2.0, jnp.float32),
         jnp.ones((1, H), jnp.float32)], axis=1)                  # (1, 4H)
    emb_gates = emb_gates * gscale
    w_hh = p["w_hh"] * gscale                                     # (H, 4H)

    # Feature BN -> MLP layer 1.
    s_f = p["fbn_g"] * jax.lax.rsqrt(p["fbn_v"] + EPS)            # (1, FEAT)
    t_f = p["fbn_b"] - p["fbn_m"] * s_f
    w1f = p["w1f"] * s_f.T                                        # (FEAT, D_MLP)
    b1 = p["b1"] + t_f @ p["w1f"]                                 # (1, D_MLP)

    # bn1 -> MLP layer 2.
    s1 = p["bn1_g"] * jax.lax.rsqrt(p["bn1_v"] + EPS)
    t1 = p["bn1_b"] - p["bn1_m"] * s1
    w2 = p["w2"] * s1.T
    b2 = p["b2"] + t1 @ p["w2"]

    # bn2 -> output Linear.
    s2 = p["bn2_g"] * jax.lax.rsqrt(p["bn2_v"] + EPS)
    t2 = p["bn2_b"] - p["bn2_m"] * s2
    wo = p["wo"] * s2.T
    bo = p["bo"] + t2 @ p["wo"]

    # Pack everything the kernel needs into one lane-dense (SLAB_ROWS, 128) slab.
    def pad_block(x, rows=None):
        r, c = x.shape
        rows = r if rows is None else rows
        return jnp.pad(x, ((0, rows - r), (0, LANES - c)))

    slab = jnp.concatenate([
        pad_block(w_hh),           # rows   0:32
        pad_block(w1f),            # rows  32:160
        pad_block(w2),             # rows 160:224
        pad_block(wo),             # rows 224:288
        pad_block(b2, rows=8),     # rows 288:296 (data in row 288)
        pad_block(bo, rows=8),     # rows 296:304 (data in row 296)
    ], axis=0).astype(jnp.float32)
    assert slab.shape == (SLAB_ROWS, LANES)

    return {"emb_gates": emb_gates, "slab": slab, "w1e": p["w1e"], "b1": b1}


def forward(fp, sentence1, sentence2):
    # Stack both sentences along the batch axis (2B = 8 rows = one f32 sublane tile)
    # and gather the pre-folded per-token gate contributions (S, 2B, 4H).
    tokens = jnp.concatenate([sentence1, sentence2], axis=1)      # (S, 2B) int32
    xg = fp["emb_gates"][tokens]                                  # (S, 2B, 4H) f32
    extra = sentence_features(sentence1, sentence2)               # (B, 7)
    # K=7 extra-feature contribution + b1 precomputed here (removes a pathological
    # MXU op and two tiny DMAs from the kernel).
    h1_bias = extra @ fp["w1e"] + fp["b1"]                        # (B, D_MLP)
    return fused_forward_call(xg, fp["slab"], h1_bias)            # (B, D_OUT) log-probs


if __name__ == "__main__":
    key = jax.random.PRNGKey(0)
    k_p, k_s1, k_s2 = jax.random.split(key, 3)
    params = init_params(k_p)
    folded = jax.tree.map(jax.block_until_ready, fold_params(params))
    sentence1 = jax.random.randint(k_s1, (SEQ, BATCH), 2, N_EMBED, dtype=jnp.int32)
    sentence2 = jax.random.randint(k_s2, (SEQ, BATCH), 2, N_EMBED, dtype=jnp.int32)

    scores = jax.jit(forward)(folded, sentence1, sentence2)
    jax.block_until_ready(scores)
    assert scores.shape == (BATCH, D_OUT)
    print("KERNEL_OK")
</pallas_src>

<mosaic_0001>
module attributes {stable_mosaic.version = 11 : i64} {
  func.func @fused_kernel(%arg0: memref<8x8x128xf32, #tpu.memory_space<vmem>>, %arg1: memref<304x128xf32, #tpu.memory_space<vmem>>, %arg2: memref<4x64xf32, #tpu.memory_space<vmem>>, %arg3: memref<4x2xf32, #tpu.memory_space<vmem>>) attributes {dimension_semantics = [], scalar_prefetch = 0 : i64, scratch_operands = 0 : i64, tpu.core_type = #tpu.core_type<tc>} {
    %c0 = arith.constant 0 : index
    %c0_0 = arith.constant 0 : index
    %0 = vector.load %arg1[%c0, %c0_0] : memref<304x128xf32, #tpu.memory_space<vmem>>, vector<32x128xf32>
    %1 = arith.truncf %0 : vector<32x128xf32> to vector<32x128xbf16>
    %c0_1 = arith.constant 0 : index
    %c0_2 = arith.constant 0 : index
    %c0_3 = arith.constant 0 : index
    %2 = vector.load %arg0[%c0_1, %c0_2, %c0_3] : memref<8x8x128xf32, #tpu.memory_space<vmem>>, vector<1x8x128xf32>
    %3 = vector.shape_cast %2 : vector<1x8x128xf32> to vector<8x128xf32>
    %4 = arith.negf %3 : vector<8x128xf32>
    %5 = math.exp %4 : vector<8x128xf32>
    %cst = arith.constant 1.000000e+00 : f32
    %6 = vector.broadcast %cst : f32 to vector<8x128xf32>
    %7 = arith.addf %6, %5 : vector<8x128xf32>
    %8 = arith.divf %6, %7 : vector<8x128xf32>
    %9 = vector.extract_strided_slice %8 {offsets = [0, 0], sizes = [8, 32], strides = [1, 1]} : vector<8x128xf32> to vector<8x32xf32>
    %10 = vector.extract_strided_slice %8 {offsets = [0, 64], sizes = [8, 32], strides = [1, 1]} : vector<8x128xf32> to vector<8x32xf32>
    %cst_4 = arith.constant 2.000000e+00 : f32
    %11 = vector.broadcast %cst_4 : f32 to vector<8x32xf32>
    %12 = arith.mulf %11, %10 : vector<8x32xf32>
    %cst_5 = arith.constant 1.000000e+00 : f32
    %13 = vector.broadcast %cst_5 : f32 to vector<8x32xf32>
    %14 = arith.subf %12, %13 : vector<8x32xf32>
    %15 = vector.extract_strided_slice %8 {offsets = [0, 96], sizes = [8, 32], strides = [1, 1]} : vector<8x128xf32> to vector<8x32xf32>
    %16 = arith.mulf %9, %14 : vector<8x32xf32>
    %17 = math.tanh %16 : vector<8x32xf32>
    %18 = arith.mulf %15, %17 : vector<8x32xf32>
    %c1 = arith.constant 1 : index
    %c0_6 = arith.constant 0 : index
    %c0_7 = arith.constant 0 : index
    %19 = vector.load %arg0[%c1, %c0_6, %c0_7] : memref<8x8x128xf32, #tpu.memory_space<vmem>>, vector<1x8x128xf32>
    %20 = vector.shape_cast %19 : vector<1x8x128xf32> to vector<8x128xf32>
    %21 = arith.truncf %18 : vector<8x32xf32> to vector<8x32xbf16>
    %cst_8 = arith.constant dense<0.000000e+00> : vector<8x128xf32>
    %22 = tpu.matmul %21, %1, %cst_8 {dimension_numbers = #tpu.dot_dimension_numbers<[1], [0], [0], [1], [0, 0, 1, 1], [], []>} : vector<8x32xbf16>, vector<32x128xbf16>, vector<8x128xf32> -> vector<8x128xf32>
    %23 = arith.addf %20, %22 : vector<8x128xf32>
    %24 = arith.negf %23 : vector<8x128xf32>
    %25 = math.exp %24 : vector<8x128xf32>
    %cst_9 = arith.constant 1.000000e+00 : f32
    %26 = vector.broadcast %cst_9 : f32 to vector<8x128xf32>
    %27 = arith.addf %26, %25 : vector<8x128xf32>
    %28 = arith.divf %26, %27 : vector<8x128xf32>
    %29 = vector.extract_strided_slice %28 {offsets = [0, 0], sizes = [8, 32], strides = [1, 1]} : vector<8x128xf32> to vector<8x32xf32>
    %30 = vector.extract_strided_slice %28 {offsets = [0, 32], sizes = [8, 32], strides = [1, 1]} : vector<8x128xf32> to vector<8x32xf32>
    %31 = vector.extract_strided_slice %28 {offsets = [0, 64], sizes = [8, 32], strides = [1, 1]} : vector<8x128xf32> to vector<8x32xf32>
    %cst_10 = arith.constant 2.000000e+00 : f32
    %32 = vector.broadcast %cst_10 : f32 to vector<8x32xf32>
    %33 = arith.mulf %32, %31 : vector<8x32xf32>
    %cst_11 = arith.constant 1.000000e+00 : f32
    %34 = vector.broadcast %cst_11 : f32 to vector<8x32xf32>
    %35 = arith.subf %33, %34 : vector<8x32xf32>
    %36 = vector.extract_strided_slice %28 {offsets = [0, 96], sizes = [8, 32], strides = [1, 1]} : vector<8x128xf32> to vector<8x32xf32>
    %37 = arith.mulf %30, %16 : vector<8x32xf32>
    %38 = arith.mulf %29, %35 : vector<8x32xf32>
    %39 = arith.addf %37, %38 : vector<8x32xf32>
    %40 = math.tanh %39 : vector<8x32xf32>
    %41 = arith.mulf %36, %40 : vector<8x32xf32>
    %c2 = arith.constant 2 : index
    %c0_12 = arith.constant 0 : index
    %c0_13 = arith.constant 0 : index
    %42 = vector.load %arg0[%c2, %c0_12, %c0_13] : memref<8x8x128xf32, #tpu.memory_space<vmem>>, vector<1x8x128xf32>
    %43 = vector.shape_cast %42 : vector<1x8x128xf32> to vector<8x128xf32>
    %44 = arith.truncf %41 : vector<8x32xf32> to vector<8x32xbf16>
    %cst_14 = arith.constant dense<0.000000e+00> : vector<8x128xf32>
    %45 = tpu.matmul %44, %1, %cst_14 {dimension_numbers = #tpu.dot_dimension_numbers<[1], [0], [0], [1], [0, 0, 1, 1], [], []>} : vector<8x32xbf16>, vector<32x128xbf16>, vector<8x128xf32> -> vector<8x128xf32>
    %46 = arith.addf %43, %45 : vector<8x128xf32>
    %47 = arith.negf %46 : vector<8x128xf32>
    %48 = math.exp %47 : vector<8x128xf32>
    %cst_15 = arith.constant 1.000000e+00 : f32
    %49 = vector.broadcast %cst_15 : f32 to vector<8x128xf32>
    %50 = arith.addf %49, %48 : vector<8x128xf32>
    %51 = arith.divf %49, %50 : vector<8x128xf32>
    %52 = vector.extract_strided_slice %51 {offsets = [0, 0], sizes = [8, 32], strides = [1, 1]} : vector<8x128xf32> to vector<8x32xf32>
    %53 = vector.extract_strided_slice %51 {offsets = [0, 32], sizes = [8, 32], strides = [1, 1]} : vector<8x128xf32> to vector<8x32xf32>
    %54 = vector.extract_strided_slice %51 {offsets = [0, 64], sizes = [8, 32], strides = [1, 1]} : vector<8x128xf32> to vector<8x32xf32>
    %cst_16 = arith.constant 2.000000e+00 : f32
    %55 = vector.broadcast %cst_16 : f32 to vector<8x32xf32>
    %56 = arith.mulf %55, %54 : vector<8x32xf32>
    %cst_17 = arith.constant 1.000000e+00 : f32
    %57 = vector.broadcast %cst_17 : f32 to vector<8x32xf32>
    %58 = arith.subf %56, %57 : vector<8x32xf32>
    %59 = vector.extract_strided_slice %51 {offsets = [0, 96], sizes = [8, 32], strides = [1, 1]} : vector<8x128xf32> to vector<8x32xf32>
    %60 = arith.mulf %53, %39 : vector<8x32xf32>
    %61 = arith.mulf %52, %58 : vector<8x32xf32>
    %62 = arith.addf %60, %61 : vector<8x32xf32>
    %63 = math.tanh %62 : vector<8x32xf32>
    %64 = arith.mulf %59, %63 : vector<8x32xf32>
    %c3 = arith.constant 3 : index
    %c0_18 = arith.constant 0 : index
    %c0_19 = arith.constant 0 : index
    %65 = vector.load %arg0[%c3, %c0_18, %c0_19] : memref<8x8x128xf32, #tpu.memory_space<vmem>>, vector<1x8x128xf32>
    %66 = vector.shape_cast %65 : vector<1x8x128xf32> to vector<8x128xf32>
    %67 = arith.truncf %64 : vector<8x32xf32> to vector<8x32xbf16>
    %cst_20 = arith.constant dense<0.000000e+00> : vector<8x128xf32>
    %68 = tpu.matmul %67, %1, %cst_20 {dimension_numbers = #tpu.dot_dimension_numbers<[1], [0], [0], [1], [0, 0, 1, 1], [], []>} : vector<8x32xbf16>, vector<32x128xbf16>, vector<8x128xf32> -> vector<8x128xf32>
    %69 = arith.addf %66, %68 : vector<8x128xf32>
    %70 = arith.negf %69 : vector<8x128xf32>
    %71 = math.exp %70 : vector<8x128xf32>
    %cst_21 = arith.constant 1.000000e+00 : f32
    %72 = vector.broadcast %cst_21 : f32 to vector<8x128xf32>
    %73 = arith.addf %72, %71 : vector<8x128xf32>
    %74 = arith.divf %72, %73 : vector<8x128xf32>
    %75 = vector.extract_strided_slice %74 {offsets = [0, 0], sizes = [8, 32], strides = [1, 1]} : vector<8x128xf32> to vector<8x32xf32>
    %76 = vector.extract_strided_slice %74 {offsets = [0, 32], sizes = [8, 32], strides = [1, 1]} : vector<8x128xf32> to vector<8x32xf32>
    %77 = vector.extract_strided_slice %74 {offsets = [0, 64], sizes = [8, 32], strides = [1, 1]} : vector<8x128xf32> to vector<8x32xf32>
    %cst_22 = arith.constant 2.000000e+00 : f32
    %78 = vector.broadcast %cst_22 : f32 to vector<8x32xf32>
    %79 = arith.mulf %78, %77 : vector<8x32xf32>
    %cst_23 = arith.constant 1.000000e+00 : f32
    %80 = vector.broadcast %cst_23 : f32 to vector<8x32xf32>
    %81 = arith.subf %79, %80 : vector<8x32xf32>
    %82 = vector.extract_strided_slice %74 {offsets = [0, 96], sizes = [8, 32], strides = [1, 1]} : vector<8x128xf32> to vector<8x32xf32>
    %83 = arith.mulf %76, %62 : vector<8x32xf32>
    %84 = arith.mulf %75, %81 : vector<8x32xf32>
    %85 = arith.addf %83, %84 : vector<8x32xf32>
    %86 = math.tanh %85 : vector<8x32xf32>
    %87 = arith.mulf %82, %86 : vector<8x32xf32>
    %c4 = arith.constant 4 : index
    %c0_24 = arith.constant 0 : index
    %c0_25 = arith.constant 0 : index
    %88 = vector.load %arg0[%c4, %c0_24, %c0_25] : memref<8x8x128xf32, #tpu.memory_space<vmem>>, vector<1x8x128xf32>
    %89 = vector.shape_cast %88 : vector<1x8x128xf32> to vector<8x128xf32>
    %90 = arith.truncf %87 : vector<8x32xf32> to vector<8x32xbf16>
    %cst_26 = arith.constant dense<0.000000e+00> : vector<8x128xf32>
    %91 = tpu.matmul %90, %1, %cst_26 {dimension_numbers = #tpu.dot_dimension_numbers<[1], [0], [0], [1], [0, 0, 1, 1], [], []>} : vector<8x32xbf16>, vector<32x128xbf16>, vector<8x128xf32> -> vector<8x128xf32>
    %92 = arith.addf %89, %91 : vector<8x128xf32>
    %93 = arith.negf %92 : vector<8x128xf32>
    %94 = math.exp %93 : vector<8x128xf32>
    %cst_27 = arith.constant 1.000000e+00 : f32
    %95 = vector.broadcast %cst_27 : f32 to vector<8x128xf32>
    %96 = arith.addf %95, %94 : vector<8x128xf32>
    %97 = arith.divf %95, %96 : vector<8x128xf32>
    %98 = vector.extract_strided_slice %97 {offsets = [0, 0], sizes = [8, 32], strides = [1, 1]} : vector<8x128xf32> to vector<8x32xf32>
    %99 = vector.extract_strided_slice %97 {offsets = [0, 32], sizes = [8, 32], strides = [1, 1]} : vector<8x128xf32> to vector<8x32xf32>
    %100 = vector.extract_strided_slice %97 {offsets = [0, 64], sizes = [8, 32], strides = [1, 1]} : vector<8x128xf32> to vector<8x32xf32>
    %cst_28 = arith.constant 2.000000e+00 : f32
    %101 = vector.broadcast %cst_28 : f32 to vector<8x32xf32>
    %102 = arith.mulf %101, %100 : vector<8x32xf32>
    %cst_29 = arith.constant 1.000000e+00 : f32
    %103 = vector.broadcast %cst_29 : f32 to vector<8x32xf32>
    %104 = arith.subf %102, %103 : vector<8x32xf32>
    %105 = vector.extract_strided_slice %97 {offsets = [0, 96], sizes = [8, 32], strides = [1, 1]} : vector<8x128xf32> to vector<8x32xf32>
    %106 = arith.mulf %99, %85 : vector<8x32xf32>
    %107 = arith.mulf %98, %104 : vector<8x32xf32>
    %108 = arith.addf %106, %107 : vector<8x32xf32>
    %109 = math.tanh %108 : vector<8x32xf32>
    %110 = arith.mulf %105, %109 : vector<8x32xf32>
    %c5 = arith.constant 5 : index
    %c0_30 = arith.constant 0 : index
    %c0_31 = arith.constant 0 : index
    %111 = vector.load %arg0[%c5, %c0_30, %c0_31] : memref<8x8x128xf32, #tpu.memory_space<vmem>>, vector<1x8x128xf32>
    %112 = vector.shape_cast %111 : vector<1x8x128xf32> to vector<8x128xf32>
    %113 = arith.truncf %110 : vector<8x32xf32> to vector<8x32xbf16>
    %cst_32 = arith.constant dense<0.000000e+00> : vector<8x128xf32>
    %114 = tpu.matmul %113, %1, %cst_32 {dimension_numbers = #tpu.dot_dimension_numbers<[1], [0], [0], [1], [0, 0, 1, 1], [], []>} : vector<8x32xbf16>, vector<32x128xbf16>, vector<8x128xf32> -> vector<8x128xf32>
    %115 = arith.addf %112, %114 : vector<8x128xf32>
    %116 = arith.negf %115 : vector<8x128xf32>
    %117 = math.exp %116 : vector<8x128xf32>
    %cst_33 = arith.constant 1.000000e+00 : f32
    %118 = vector.broadcast %cst_33 : f32 to vector<8x128xf32>
    %119 = arith.addf %118, %117 : vector<8x128xf32>
    %120 = arith.divf %118, %119 : vector<8x128xf32>
    %121 = vector.extract_strided_slice %120 {offsets = [0, 0], sizes = [8, 32], strides = [1, 1]} : vector<8x128xf32> to vector<8x32xf32>
    %122 = vector.extract_strided_slice %120 {offsets = [0, 32], sizes = [8, 32], strides = [1, 1]} : vector<8x128xf32> to vector<8x32xf32>
    %123 = vector.extract_strided_slice %120 {offsets = [0, 64], sizes = [8, 32], strides = [1, 1]} : vector<8x128xf32> to vector<8x32xf32>
    %cst_34 = arith.constant 2.000000e+00 : f32
    %124 = vector.broadcast %cst_34 : f32 to vector<8x32xf32>
    %125 = arith.mulf %124, %123 : vector<8x32xf32>
    %cst_35 = arith.constant 1.000000e+00 : f32
    %126 = vector.broadcast %cst_35 : f32 to vector<8x32xf32>
    %127 = arith.subf %125, %126 : vector<8x32xf32>
    %128 = vector.extract_strided_slice %120 {offsets = [0, 96], sizes = [8, 32], strides = [1, 1]} : vector<8x128xf32> to vector<8x32xf32>
    %129 = arith.mulf %122, %108 : vector<8x32xf32>
    %130 = arith.mulf %121, %127 : vector<8x32xf32>
    %131 = arith.addf %129, %130 : vector<8x32xf32>
    %132 = math.tanh %131 : vector<8x32xf32>
    %133 = arith.mulf %128, %132 : vector<8x32xf32>
    %c6 = arith.constant 6 : index
    %c0_36 = arith.constant 0 : index
    %c0_37 = arith.constant 0 : index
    %134 = vector.load %arg0[%c6, %c0_36, %c0_37] : memref<8x8x128xf32, #tpu.memory_space<vmem>>, vector<1x8x128xf32>
    %135 = vector.shape_cast %134 : vector<1x8x128xf32> to vector<8x128xf32>
    %136 = arith.truncf %133 : vector<8x32xf32> to vector<8x32xbf16>
    %cst_38 = arith.constant dense<0.000000e+00> : vector<8x128xf32>
    %137 = tpu.matmul %136, %1, %cst_38 {dimension_numbers = #tpu.dot_dimension_numbers<[1], [0], [0], [1], [0, 0, 1, 1], [], []>} : vector<8x32xbf16>, vector<32x128xbf16>, vector<8x128xf32> -> vector<8x128xf32>
    %138 = arith.addf %135, %137 : vector<8x128xf32>
    %139 = arith.negf %138 : vector<8x128xf32>
    %140 = math.exp %139 : vector<8x128xf32>
    %cst_39 = arith.constant 1.000000e+00 : f32
    %141 = vector.broadcast %cst_39 : f32 to vector<8x128xf32>
    %142 = arith.addf %141, %140 : vector<8x128xf32>
    %143 = arith.divf %141, %142 : vector<8x128xf32>
    %144 = vector.extract_strided_slice %143 {offsets = [0, 0], sizes = [8, 32], strides = [1, 1]} : vector<8x128xf32> to vector<8x32xf32>
    %145 = vector.extract_strided_slice %143 {offsets = [0, 32], sizes = [8, 32], strides = [1, 1]} : vector<8x128xf32> to vector<8x32xf32>
    %146 = vector.extract_strided_slice %143 {offsets = [0, 64], sizes = [8, 32], strides = [1, 1]} : vector<8x128xf32> to vector<8x32xf32>
    %cst_40 = arith.constant 2.000000e+00 : f32
    %147 = vector.broadcast %cst_40 : f32 to vector<8x32xf32>
    %148 = arith.mulf %147, %146 : vector<8x32xf32>
    %cst_41 = arith.constant 1.000000e+00 : f32
    %149 = vector.broadcast %cst_41 : f32 to vector<8x32xf32>
    %150 = arith.subf %148, %149 : vector<8x32xf32>
    %151 = vector.extract_strided_slice %143 {offsets = [0, 96], sizes = [8, 32], strides = [1, 1]} : vector<8x128xf32> to vector<8x32xf32>
    %152 = arith.mulf %145, %131 : vector<8x32xf32>
    %153 = arith.mulf %144, %150 : vector<8x32xf32>
    %154 = arith.addf %152, %153 : vector<8x32xf32>
    %155 = math.tanh %154 : vector<8x32xf32>
    %156 = arith.mulf %151, %155 : vector<8x32xf32>
    %c7 = arith.constant 7 : index
    %c0_42 = arith.constant 0 : index
    %c0_43 = arith.constant 0 : index
    %157 = vector.load %arg0[%c7, %c0_42, %c0_43] : memref<8x8x128xf32, #tpu.memory_space<vmem>>, vector<1x8x128xf32>
    %158 = vector.shape_cast %157 : vector<1x8x128xf32> to vector<8x128xf32>
    %159 = arith.truncf %156 : vector<8x32xf32> to vector<8x32xbf16>
    %cst_44 = arith.constant dense<0.000000e+00> : vector<8x128xf32>
    %160 = tpu.matmul %159, %1, %cst_44 {dimension_numbers = #tpu.dot_dimension_numbers<[1], [0], [0], [1], [0, 0, 1, 1], [], []>} : vector<8x32xbf16>, vector<32x128xbf16>, vector<8x128xf32> -> vector<8x128xf32>
    %161 = arith.addf %158, %160 : vector<8x128xf32>
    %162 = arith.negf %161 : vector<8x128xf32>
    %163 = math.exp %162 : vector<8x128xf32>
    %cst_45 = arith.constant 1.000000e+00 : f32
    %164 = vector.broadcast %cst_45 : f32 to vector<8x128xf32>
    %165 = arith.addf %164, %163 : vector<8x128xf32>
    %166 = arith.divf %164, %165 : vector<8x128xf32>
    %167 = vector.extract_strided_slice %166 {offsets = [0, 0], sizes = [8, 32], strides = [1, 1]} : vector<8x128xf32> to vector<8x32xf32>
    %168 = vector.extract_strided_slice %166 {offsets = [0, 32], sizes = [8, 32], strides = [1, 1]} : vector<8x128xf32> to vector<8x32xf32>
    %169 = vector.extract_strided_slice %166 {offsets = [0, 64], sizes = [8, 32], strides = [1, 1]} : vector<8x128xf32> to vector<8x32xf32>
    %cst_46 = arith.constant 2.000000e+00 : f32
    %170 = vector.broadcast %cst_46 : f32 to vector<8x32xf32>
    %171 = arith.mulf %170, %169 : vector<8x32xf32>
    %cst_47 = arith.constant 1.000000e+00 : f32
    %172 = vector.broadcast %cst_47 : f32 to vector<8x32xf32>
    %173 = arith.subf %171, %172 : vector<8x32xf32>
    %174 = vector.extract_strided_slice %166 {offsets = [0, 96], sizes = [8, 32], strides = [1, 1]} : vector<8x128xf32> to vector<8x32xf32>
    %175 = arith.mulf %168, %154 : vector<8x32xf32>
    %176 = arith.mulf %167, %173 : vector<8x32xf32>
    %177 = arith.addf %175, %176 : vector<8x32xf32>
    %178 = math.tanh %177 : vector<8x32xf32>
    %179 = arith.mulf %174, %178 : vector<8x32xf32>
    %180 = vector.extract_strided_slice %179 {offsets = [0, 0], sizes = [4, 32], strides = [1, 1]} : vector<8x32xf32> to vector<4x32xf32>
    %181 = vector.extract_strided_slice %179 {offsets = [4, 0], sizes = [4, 32], strides = [1, 1]} : vector<8x32xf32> to vector<4x32xf32>
    %182 = arith.subf %180, %181 : vector<4x32xf32>
    %183 = arith.mulf %180, %181 : vector<4x32xf32>
    %184 = tpu.concatenate %180, %181, %182, %183 in 1 : vector<4x32xf32>, vector<4x32xf32>, vector<4x32xf32>, vector<4x32xf32> -> vector<4x128xf32>
    %c32 = arith.constant 32 : index
    %c0_48 = arith.constant 0 : index
    %185 = vector.load %arg1[%c32, %c0_48] : memref<304x128xf32, #tpu.memory_space<vmem>>, vector<128x64xf32>
    %cst_49 = arith.constant dense<0.000000e+00> : vector<4x64xf32>
    %186 = tpu.matmul %184, %185, %cst_49 {dimension_numbers = #tpu.dot_dimension_numbers<[1], [0], [0], [1], [0, 0, 1, 1], [], []>} : vector<4x128xf32>, vector<128x64xf32>, vector<4x64xf32> -> vector<4x64xf32>
    %c0_50 = arith.constant 0 : index
    %c0_51 = arith.constant 0 : index
    %187 = vector.load %arg2[%c0_50, %c0_51] : memref<4x64xf32, #tpu.memory_space<vmem>>, vector<4x64xf32>
    %188 = arith.addf %186, %187 : vector<4x64xf32>
    %cst_52 = arith.constant 0.000000e+00 : f32
    %189 = vector.broadcast %cst_52 : f32 to vector<4x64xf32>
    %190 = arith.maximumf %188, %189 : vector<4x64xf32>
    %c160 = arith.constant 160 : index
    %c0_53 = arith.constant 0 : index
    %191 = vector.load %arg1[%c160, %c0_53] : memref<304x128xf32, #tpu.memory_space<vmem>>, vector<64x64xf32>
    %c288 = arith.constant 288 : index
    %c0_54 = arith.constant 0 : index
    %192 = vector.load %arg1[%c288, %c0_54] : memref<304x128xf32, #tpu.memory_space<vmem>>, vector<1x64xf32>
    %cst_55 = arith.constant dense<0.000000e+00> : vector<4x64xf32>
    %193 = tpu.matmul %190, %191, %cst_55 {dimension_numbers = #tpu.dot_dimension_numbers<[1], [0], [0], [1], [0, 0, 1, 1], [], []>} : vector<4x64xf32>, vector<64x64xf32>, vector<4x64xf32> -> vector<4x64xf32>
    %194 = vector.broadcast %192 : vector<1x64xf32> to vector<4x64xf32>
    %195 = arith.addf %193, %194 : vector<4x64xf32>
    %cst_56 = arith.constant 0.000000e+00 : f32
    %196 = vector.broadcast %cst_56 : f32 to vector<4x64xf32>
    %197 = arith.maximumf %195, %196 : vector<4x64xf32>
    %c224 = arith.constant 224 : index
    %c0_57 = arith.constant 0 : index
    %198 = vector.load %arg1[%c224, %c0_57] : memref<304x128xf32, #tpu.memory_space<vmem>>, vector<64x2xf32>
    %c296 = arith.constant 296 : index
    %c0_58 = arith.constant 0 : index
    %199 = vector.load %arg1[%c296, %c0_58] : memref<304x128xf32, #tpu.memory_space<vmem>>, vector<1x2xf32>
    %cst_59 = arith.constant dense<0.000000e+00> : vector<4x2xf32>
    %200 = tpu.matmul %197, %198, %cst_59 {dimension_numbers = #tpu.dot_dimension_numbers<[1], [0], [0], [1], [0, 0, 1, 1], [], []>} : vector<4x64xf32>, vector<64x2xf32>, vector<4x2xf32> -> vector<4x2xf32>
    %201 = vector.broadcast %199 : vector<1x2xf32> to vector<4x2xf32>
    %202 = arith.addf %200, %201 : vector<4x2xf32>
    %cst_60 = arith.constant dense<0xFF800000> : vector<4xf32>
    %203 = vector.multi_reduction <maximumf>, %202, %cst_60 [1] : vector<4x2xf32> to vector<4xf32>
    %204 = vector.shape_cast %203 : vector<4xf32> to vector<4x1xf32>
    %205 = vector.broadcast %204 : vector<4x1xf32> to vector<4x2xf32>
    %206 = arith.subf %202, %205 : vector<4x2xf32>
    %207 = math.exp %206 : vector<4x2xf32>
    %cst_61 = arith.constant dense<0.000000e+00> : vector<4xf32>
    %208 = vector.multi_reduction <add>, %207, %cst_61 [1] : vector<4x2xf32> to vector<4xf32>
    %209 = vector.shape_cast %208 : vector<4xf32> to vector<4x1xf32>
    %210 = math.log %209 : vector<4x1xf32>
    %211 = arith.addf %204, %210 : vector<4x1xf32>
    %212 = vector.broadcast %211 : vector<4x1xf32> to vector<4x2xf32>
    %213 = arith.subf %202, %212 : vector<4x2xf32>
    %c0_62 = arith.constant 0 : index
    %c0_63 = arith.constant 0 : index
    %214 = vector.load %arg3[%c0_62, %c0_63] : memref<4x2xf32, #tpu.memory_space<vmem>>, vector<4x2xf32>
    tpu.vector_store %arg3[%c0_62, %c0_63], %213 {strides = array<i32>} : memref<4x2xf32, #tpu.memory_space<vmem>>, vector<4x2xf32>,
    return
  }
}

</mosaic_0001>

<bundles_post_ra>
// kernel: forward.1
= control target key start
LH: loop header
LB: loop body
LE: loop exit
PB: predicated region body
PF: predicated region fallthrough
CT: control target
= control target key end

     0   :  { %s1147_s14 = smov 64   ;;  %v1148_v9 = vmov 0.0   ;;  %vm1149_vm0 = vmmov 0   ;;  %s1150_s23 = smov 96   ;;  %vm47_vm1 = vcmask 261120   ;;  %vm587_vm2 = vcmask 523264   ;;  %s1454_s0 = inlined_call_operand.vmem [shape: f32[8,8,128], index: 0, kind: input, shape index: {}]   ;;  %s1455_s1 = inlined_call_operand.vmem [shape: f32[304,128], index: 1, kind: input, shape index: {}]   ;;  %s1456_s2 = inlined_call_operand.vmem [shape: f32[4,64], index: 2, kind: input, shape index: {}]   ;;  %s1457_s3 = inlined_call_operand.vmem [shape: f32[4,2], index: 3, kind: output, shape index: {}]  }
   0x1   :  { %v21_v0 = vld [vmem:[%s1454_s0] sm:$0xff]  ;;  %961 = vmatprep.subr.bf16.mxu0 %v1148_v9  ;;  %v17_v10 = vld [vmem:[%s1455_s1 + $0x10] sm:$0xff]  ;;  %v18_v11 = vld [vmem:[%s1455_s1 + $0x18] sm:$0xff]  ;;  %965 = vmatprep.mubr.msk.bf16.mxu0 %vm1149_vm0, %v1148_v9  ;;  %s1151_s24 = smov 32   ;;  %vm589_vm3 = vcmask 785408   ;;  %vm852_vm4 = vcmask 11264  }
   0x2   :  { %v871_v1 = vmul.f32 -1.442695, %v21_v0  ;;  %v15_v12 = vld [vmem:[%s1455_s1] sm:$0xff]  ;;  %v1188_v13 = vpack.c.bf16 %v18_v11, %v17_v10  ;;  %v16_v14 = vld [vmem:[%s1455_s1 + $0x8] sm:$0xff]  ;;  %969 = vmatprep.subr.bf16.mxu1 %v1148_v9  ;;  %973 = vmatprep.mubr.msk.bf16.mxu1 %vm1149_vm0, %v1148_v9  ;;  %v877_v44 = vld [vmem:[%s1454_s0 + $0x10] sm:$0xff] }
   0x3   :  { %v1197_v15 = vpack.c.bf16 %v16_v14, %v15_v12  ;;  %v873_v21 = vld [vmem:[%s1454_s0 + $0x8] sm:$0xff] }
   0x4   :  { %1095 = vpow2.f32 %v871_v1  ;;  %962 = vmatpush3.bf16.msra.mxu0 %v1188_v13  ;;  %970 = vmatpush3.bf16.msra.mxu1 %v1188_v13 }
   0x5   :  { %963 = vmatprep.subr.bf16.mxu0 %v1148_v9  ;;  %971 = vmatprep.subr.bf16.mxu1 %v1148_v9 }
   0x8   :  { %964 = vmatpush3.bf16.msra.mxu0 %v1197_v15  ;;  %972 = vmatpush3.bf16.msra.mxu1 %v1197_v15 }
   0x9   :  { %977 = vmatprep.subr.bf16.mxu0 %v1148_v9  ;;  %985 = vmatprep.subr.bf16.mxu1 %v1148_v9 }
  0x11   :  { %v1096_v2 = vpop.eup %1095 }
  0x12   :  { %v25_v3 = vadd.f32 1.0, %v1096_v2  ;;  %v881_v2 = vld [vmem:[%s1454_s0 + $0x18] sm:$0xff] }
  0x14   :  { %1097 = vrcp.f32 %v25_v3 }
  0x21   :  { %v1098_v4 = vpop.eup %1097 }
  0x22   :  { %v28_v5 = vmul.f32 2.0, %v1098_v4 }
  0x24   :  { %v872_v6 = vadd.f32 -1.0, %v28_v5 }
  0x26   :  { %31 = vrot.lane.b32.xlu0 %v872_v6, %s1147_s14 }
  0x98   :  { %v32_v7 = vpop.permute.xlu0 %31 }
  0x99   :  { %v34_v8 = vmul.f32 %v1098_v4, %v32_v7 }
  0x9b   :  { %1099 = vtanh.f32 %v34_v8 }
  0xa8   :  { %v1100_v16 = vpop.eup %1099 }
  0xa9   :  { %37 = vrot.lane.b32.xlu0 %v1100_v16, %s1150_s23 }
  0xad   :  { %101 = vrot.lane.b32.xlu0 %v34_v8, %s1151_s24 }
 0x11b   :  { %v38_v17 = vpop.permute.xlu0 %37 }
 0x11c   :  { %v40_v18 = vmul.f32 %v1098_v4, %v38_v17 }
 0x11e   :  { %v43_v19 = vpack.c.bf16 %v40_v18, %v40_v18 }
 0x11f   :  { %v102_v35 = vpop.permute.xlu0 %101 }
 0x120   :  { %45 = vrot.lane.b32.xlu1 %v43_v19, %s1151_s24 }
 0x192   :  { %v46_v20 = vpop.permute.xlu1 %45 }
 0x193   :  { %966 = vmatmul.mubr.msk.bf16.vlgmr.msra.gmra.mxu0 %vm47_vm1, %v46_v20 }
 0x194   :  { %978 = vmatpush3.bf16.msra.mxu0 %v1188_v13  ;;  %981 = vmatprep.mubr.msk.bf16.mxu0 %vm1149_vm0, %v1148_v9 }
 0x195   :  { %979 = vmatprep.subr.bf16.mxu0 %v1148_v9 }
 0x198   :  { %980 = vmatpush3.bf16.msra.mxu0 %v1197_v15 }
 0x199   :  { %993 = vmatprep.subr.bf16.mxu0 %v1148_v9 }
 0x253   :  { %v85_v22 = vpop.f32.mrf.mxu0 }
 0x254   :  { %v91_v23 = vadd.f32 %v873_v21, %v85_v22 }
 0x255   :  { %v967_v24 = vpop.f32.mrf.mxu0 }
 0x256   :  { %v875_v25 = vmul.f32 -1.442695, %v91_v23 }
 0x257   :  { %v88_v26 = vpop.f32.mrf.mxu0 }
 0x258   :  { %1101 = vpow2.f32 %v875_v25 }
 0x259   :  { %v968_v27 = vpop.f32.mrf.mxu0 }
 0x25a   :  { %v885_v27 = vld [vmem:[%s1454_s0 + $0x20] sm:$0xff] }
 0x265   :  { %v1102_v28 = vpop.eup %1101 }
 0x266   :  { %v95_v29 = vadd.f32 1.0, %v1102_v28 }
 0x268   :  { %1103 = vrcp.f32 %v95_v29 }
 0x275   :  { %v1104_v30 = vpop.eup %1103 }
 0x276   :  { %v98_v31 = vmul.f32 2.0, %v1104_v30  ;;  %v104_v36 = vmul.f32 %v1104_v30, %v102_v35 }
 0x278   :  { %v876_v32 = vadd.f32 -1.0, %v98_v31 }
 0x27a   :  { %106 = vrot.lane.b32.xlu1 %v876_v32, %s1147_s14 }
 0x2ec   :  { %v107_v33 = vpop.permute.xlu1 %106 }
 0x2ed   :  { %v109_v34 = vmul.f32 %v1104_v30, %v107_v33 }
 0x2ef   :  { %111 = vrot.lane.b32.xlu1 %v109_v34, %s1151_s24 }
 0x361   :  { %v112_v37 = vpop.permute.xlu1 %111 }
 0x362   :  { %v114_v38 = vadd.f32 %v112_v37, %v104_v36 }
 0x364   :  { %1105 = vtanh.f32 %v114_v38 }
 0x371   :  { %v1106_v39 = vpop.eup %1105 }
 0x372   :  { %117 = vrot.lane.b32.xlu0 %v1106_v39, %s1147_s14 }
 0x3e4   :  { %v118_v40 = vpop.permute.xlu0 %117 }
 0x3e5   :  { %v120_v41 = vmul.f32 %v1104_v30, %v118_v40 }
 0x3e7   :  { %v123_v42 = vpack.c.bf16 %v120_v41, %v120_v41 }
 0x3e9   :  { %125 = vrot.lane.b32.xlu1 %v123_v42, %s1151_s24 }
 0x45b   :  { %v126_v43 = vpop.permute.xlu1 %125 }
 0x45c   :  { %974 = vmatmul.mubr.msk.bf16.vlgmr.msra.gmra.mxu1 %vm47_vm1, %v126_v43 }
 0x45d   :  { %986 = vmatpush3.bf16.msra.mxu1 %v1188_v13  ;;  %989 = vmatprep.mubr.msk.bf16.mxu1 %vm1149_vm0, %v1148_v9 }
 0x45e   :  { %987 = vmatprep.subr.bf16.mxu1 %v1148_v9 }
 0x461   :  { %988 = vmatpush3.bf16.msra.mxu1 %v1197_v15 }
 0x462   :  { %1001 = vmatprep.subr.bf16.mxu1 %v1148_v9 }
 0x51c   :  { %v164_v45 = vpop.f32.mrf.mxu1 }
 0x51d   :  { %v170_v46 = vadd.f32 %v877_v44, %v164_v45 }
 0x51e   :  { %v975_v47 = vpop.f32.mrf.mxu1 }
 0x51f   :  { %v879_v48 = vmul.f32 -1.442695, %v170_v46 }
 0x520   :  { %v167_v49 = vpop.f32.mrf.mxu1 }
 0x521   :  { %1107 = vpow2.f32 %v879_v48  ;;  %v889_v49 = vld [vmem:[%s1454_s0 + $0x28] sm:$0xff] }
 0x522   :  { %v976_v50 = vpop.f32.mrf.mxu1 }
 0x52e   :  { %v1108_v51 = vpop.eup %1107 }
 0x52f   :  { %v174_v52 = vadd.f32 1.0, %v1108_v51 }
 0x531   :  { %1109 = vrcp.f32 %v174_v52 }
 0x53e   :  { %v1110_v53 = vpop.eup %1109 }
 0x53f   :  { %v177_v54 = vmul.f32 2.0, %v1110_v53  ;;  %v179_v58 = vmul.f32 %v1110_v53, %v114_v38 }
 0x541   :  { %v880_v55 = vadd.f32 -1.0, %v177_v54 }
 0x543   :  { %181 = vrot.lane.b32.xlu0 %v880_v55, %s1147_s14 }
 0x5b5   :  { %v182_v56 = vpop.permute.xlu0 %181 }
 0x5b6   :  { %v184_v57 = vmul.f32 %v1110_v53, %v182_v56 }
 0x5b8   :  { %186 = vrot.lane.b32.xlu1 %v184_v57, %s1151_s24 }
 0x62a   :  { %v187_v59 = vpop.permute.xlu1 %186 }
 0x62b   :  { %v189_v60 = vadd.f32 %v187_v59, %v179_v58 }
 0x62d   :  { %1111 = vtanh.f32 %v189_v60 }
 0x63a   :  { %v1112_v61 = vpop.eup %1111 }
 0x63b   :  { %192 = vrot.lane.b32.xlu0 %v1112_v61, %s1147_s14 }
 0x6ad   :  { %v193_v62 = vpop.permute.xlu0 %192 }
 0x6ae   :  { %v195_v63 = vmul.f32 %v1110_v53, %v193_v62 }
 0x6b0   :  { %v198_v0 = vpack.c.bf16 %v195_v63, %v195_v63 }
 0x6b2   :  { %200 = vrot.lane.b32.xlu1 %v198_v0, %s1151_s24 }
 0x724   :  { %v201_v1 = vpop.permute.xlu1 %200 }
 0x725   :  { %982 = vmatmul.mubr.msk.bf16.vlgmr.msra.gmra.mxu0 %vm47_vm1, %v201_v1 }
 0x726   :  { %994 = vmatpush3.bf16.msra.mxu0 %v1188_v13  ;;  %997 = vmatprep.mubr.msk.bf16.mxu0 %vm1149_vm0, %v1148_v9 }
 0x727   :  { %995 = vmatprep.subr.bf16.mxu0 %v1148_v9 }
 0x72a   :  { %996 = vmatpush3.bf16.msra.mxu0 %v1197_v15 }
 0x72b   :  { %1009 = vmatprep.subr.bf16.mxu0 %v1148_v9 }
 0x7e5   :  { %v239_v3 = vpop.f32.mrf.mxu0 }
 0x7e6   :  { %v245_v4 = vadd.f32 %v881_v2, %v239_v3 }
 0x7e7   :  { %v983_v5 = vpop.f32.mrf.mxu0 }
 0x7e8   :  { %v883_v6 = vmul.f32 -1.442695, %v245_v4  ;;  %v893_v5 = vld [vmem:[%s1454_s0 + $0x30] sm:$0xff] }
 0x7e9   :  { %v242_v7 = vpop.f32.mrf.mxu0 }
 0x7ea   :  { %1113 = vpow2.f32 %v883_v6 }
 0x7eb   :  { %v984_v8 = vpop.f32.mrf.mxu0 }
 0x7f7   :  { %v1114_v10 = vpop.eup %1113 }
 0x7f8   :  { %v249_v11 = vadd.f32 1.0, %v1114_v10 }
 0x7fa   :  { %1115 = vrcp.f32 %v249_v11 }
 0x807   :  { %v1116_v12 = vpop.eup %1115 }
 0x808   :  { %v252_v14 = vmul.f32 2.0, %v1116_v12  ;;  %v254_v19 = vmul.f32 %v1116_v12, %v189_v60 }
 0x80a   :  { %v884_v16 = vadd.f32 -1.0, %v252_v14 }
 0x80c   :  { %256 = vrot.lane.b32.xlu0 %v884_v16, %s1147_s14 }
 0x87e   :  { %v257_v17 = vpop.permute.xlu0 %256 }
 0x87f   :  { %v259_v18 = vmul.f32 %v1116_v12, %v257_v17 }
 0x881   :  { %261 = vrot.lane.b32.xlu1 %v259_v18, %s1151_s24 }
 0x8f3   :  { %v262_v20 = vpop.permute.xlu1 %261 }
 0x8f4   :  { %v264_v21 = vadd.f32 %v262_v20, %v254_v19 }
 0x8f6   :  { %1117 = vtanh.f32 %v264_v21 }
 0x903   :  { %v1118_v22 = vpop.eup %1117 }
 0x904   :  { %267 = vrot.lane.b32.xlu0 %v1118_v22, %s1147_s14 }
 0x976   :  { %v268_v23 = vpop.permute.xlu0 %267 }
 0x977   :  { %v270_v24 = vmul.f32 %v1116_v12, %v268_v23 }
 0x979   :  { %v273_v25 = vpack.c.bf16 %v270_v24, %v270_v24 }
 0x97b   :  { %275 = vrot.lane.b32.xlu1 %v273_v25, %s1151_s24 }
 0x9ed   :  { %v276_v26 = vpop.permute.xlu1 %275 }
 0x9ee   :  { %990 = vmatmul.mubr.msk.bf16.vlgmr.msra.gmra.mxu1 %vm47_vm1, %v276_v26 }
 0x9ef   :  { %1002 = vmatpush3.bf16.msra.mxu1 %v1188_v13  ;;  %1005 = vmatprep.mubr.msk.bf16.mxu1 %vm1149_vm0, %v1148_v9 }
 0x9f0   :  { %1003 = vmatprep.subr.bf16.mxu1 %v1148_v9 }
 0x9f3   :  { %1004 = vmatpush3.bf16.msra.mxu1 %v1197_v15 }
 0x9f4   :  { %1017 = vmatprep.subr.mxu1 %v1148_v9 }
 0xaae   :  { %v314_v28 = vpop.f32.mrf.mxu1 }
 0xaaf   :  { %v320_v29 = vadd.f32 %v885_v27, %v314_v28 }
 0xab0   :  { %v991_v30 = vpop.f32.mrf.mxu1 }
 0xab1   :  { %v887_v31 = vmul.f32 -1.442695, %v320_v29  ;;  %v897_v30 = vld [vmem:[%s1454_s0 + $0x38] sm:$0xff] }
 0xab2   :  { %v317_v32 = vpop.f32.mrf.mxu1 }
 0xab3   :  { %1119 = vpow2.f32 %v887_v31 }
 0xab4   :  { %v992_v33 = vpop.f32.mrf.mxu1 }
 0xac0   :  { %v1120_v34 = vpop.eup %1119 }
 0xac1   :  { %v324_v35 = vadd.f32 1.0, %v1120_v34 }
 0xac3   :  { %1121 = vrcp.f32 %v324_v35 }
 0xad0   :  { %v1122_v36 = vpop.eup %1121 }
 0xad1   :  { %v327_v37 = vmul.f32 2.0, %v1122_v36  ;;  %v329_v41 = vmul.f32 %v1122_v36, %v264_v21 }
 0xad3   :  { %v888_v38 = vadd.f32 -1.0, %v327_v37 }
 0xad5   :  { %331 = vrot.lane.b32.xlu0 %v888_v38, %s1147_s14 }
 0xb47   :  { %v332_v39 = vpop.permute.xlu0 %331 }
 0xb48   :  { %v334_v40 = vmul.f32 %v1122_v36, %v332_v39 }
 0xb4a   :  { %336 = vrot.lane.b32.xlu1 %v334_v40, %s1151_s24 }
 0xbbc   :  { %v337_v42 = vpop.permute.xlu1 %336 }
 0xbbd   :  { %v339_v43 = vadd.f32 %v337_v42, %v329_v41 }
 0xbbf   :  { %1123 = vtanh.f32 %v339_v43 }
 0xbcc   :  { %v1124_v44 = vpop.eup %1123 }
 0xbcd   :  { %342 = vrot.lane.b32.xlu0 %v1124_v44, %s1147_s14 }
 0xc3f   :  { %v343_v45 = vpop.permute.xlu0 %342 }
 0xc40   :  { %v345_v46 = vmul.f32 %v1122_v36, %v343_v45 }
 0xc42   :  { %v348_v47 = vpack.c.bf16 %v345_v46, %v345_v46 }
 0xc44   :  { %350 = vrot.lane.b32.xlu1 %v348_v47, %s1151_s24  ;;  %v606_v47 = vld [vmem:[%s1455_s1 + $0x98] sm:$0xff] }
 0xcb6   :  { %v351_v48 = vpop.permute.xlu1 %350 }
 0xcb7   :  { %998 = vmatmul.mubr.msk.bf16.vlgmr.msra.gmra.mxu0 %vm47_vm1, %v351_v48  ;;  %v605_v48 = vld [vmem:[%s1455_s1 + $0x90] sm:$0xff] }
 0xcb8   :  { %1010 = vmatpush3.bf16.msra.mxu0 %v1188_v13  ;;  %1013 = vmatprep.mubr.msk.bf16.mxu0 %vm1149_vm0, %v1148_v9 }
 0xcb9   :  { %1011 = vmatprep.subr.bf16.mxu0 %v1148_v9 }
 0xcbc   :  { %1012 = vmatpush3.bf16.msra.mxu0 %v1197_v15 }
 0xcbd   :  { %1052 = vmatprep.subr.mxu0 %v1148_v9 }
 0xd77   :  { %v389_v50 = vpop.f32.mrf.mxu0 }
 0xd78   :  { %v395_v51 = vadd.f32 %v889_v49, %v389_v50  ;;  %v604_v49 = vld [vmem:[%s1455_s1 + $0x88] sm:$0xff]  ;;  %v603_v50 = vld [vmem:[%s1455_s1 + $0x80] sm:$0xff] }
 0xd79   :  { %v999_v52 = vpop.f32.mrf.mxu0 }
 0xd7a   :  { %v891_v53 = vmul.f32 -1.442695, %v395_v51  ;;  %v602_v52 = vld [vmem:[%s1455_s1 + $0x78] sm:$0xff] }
 0xd7b   :  { %v392_v54 = vpop.f32.mrf.mxu0 }
 0xd7c   :  { %1125 = vpow2.f32 %v891_v53  ;;  %v601_v53 = vld [vmem:[%s1455_s1 + $0x70] sm:$0xff]  ;;  %v600_v54 = vld [vmem:[%s1455_s1 + $0x68] sm:$0xff] }
 0xd7d   :  { %v1000_v13 = vpop.f32.mrf.mxu0 }
 0xd7e   :  { %v599_v13 = vld [vmem:[%s1455_s1 + $0x60] sm:$0xff] }
 0xd89   :  { %v1126_v55 = vpop.eup %1125 }
 0xd8a   :  { %v399_v56 = vadd.f32 1.0, %v1126_v55  ;;  %v598_v55 = vld [vmem:[%s1455_s1 + $0x58] sm:$0xff] }
 0xd8c   :  { %1127 = vrcp.f32 %v399_v56  ;;  %v597_v56 = vld [vmem:[%s1455_s1 + $0x50] sm:$0xff] }
 0xd99   :  { %v1128_v57 = vpop.eup %1127 }
 0xd9a   :  { %v402_v58 = vmul.f32 2.0, %v1128_v57  ;;  %v404_v61 = vmul.f32 %v1128_v57, %v339_v43 }
 0xd9c   :  { %v892_v59 = vadd.f32 -1.0, %v402_v58  ;;  %v595_v58 = vld [vmem:[%s1455_s1 + $0x40] sm:$0xff] }
 0xd9e   :  { %406 = vrot.lane.b32.xlu0 %v892_v59, %s1147_s14  ;;  %v594_v59 = vld [vmem:[%s1455_s1 + $0x38] sm:$0xff] }
 0xe10   :  { %v407_v15 = vpop.permute.xlu0 %406 }
 0xe11   :  { %v409_v60 = vmul.f32 %v1128_v57, %v407_v15  ;;  %v593_v15 = vld [vmem:[%s1455_s1 + $0x30] sm:$0xff] }
 0xe13   :  { %411 = vrot.lane.b32.xlu1 %v409_v60, %s1151_s24  ;;  %v592_v60 = vld [vmem:[%s1455_s1 + $0x28] sm:$0xff] }
 0xe85   :  { %v412_v62 = vpop.permute.xlu1 %411 }
 0xe86   :  { %v414_v63 = vadd.f32 %v412_v62, %v404_v61  ;;  %v591_v61 = vld [vmem:[%s1455_s1 + $0x20] sm:$0xff]  ;;  %v686_v62 = vld [vmem:[%s1455_s1 + $0xd8] sm:$0xff] }
 0xe88   :  { %1129 = vtanh.f32 %v414_v63 }
 0xe95   :  { %v1130_v0 = vpop.eup %1129 }
 0xe96   :  { %417 = vrot.lane.b32.xlu0 %v1130_v0, %s1147_s14  ;;  %v684_v0 = vld [vmem:[%s1455_s1 + $0xc8] sm:$0xff] }
 0xf08   :  { %v418_v1 = vpop.permute.xlu0 %417 }
 0xf09   :  { %v420_v2 = vmul.f32 %v1128_v57, %v418_v1  ;;  %v596_v57 = vld [vmem:[%s1455_s1 + $0x48] sm:$0xff] }
 0xf0b   :  { %v423_v3 = vpack.c.bf16 %v420_v2, %v420_v2  ;;  %v683_v2 = vld [vmem:[%s1455_s1 + $0xc0] sm:$0xff] }
 0xf0d   :  { %425 = vrot.lane.b32.xlu1 %v423_v3, %s1151_s24 }
 0xf7f   :  { %v426_v4 = vpop.permute.xlu1 %425 }
 0xf80   :  { %1006 = vmatmul.mubr.msk.bf16.vlgmr.msra.gmra.mxu1 %vm47_vm1, %v426_v4  ;;  %v682_v4 = vld [vmem:[%s1455_s1 + $0xb8] sm:$0xff] }
 0xf81   :  { %1049 = vmatprep.mubr.msk.f32.mxu1 %vm1149_vm0, %v1148_v9  ;;  %1018 = vmatpush3.msra.mxu1 %v606_v47 }
 0xf82   :  { %1019 = vmatprep.subr.mxu1 %v1148_v9 }
 0xf83   :  { %1020 = vmatpush3.msra.mxu1 %v605_v48 }
 0xf84   :  { %1021 = vmatprep.subr.mxu1 %v1148_v9 }
 0xf85   :  { %1022 = vmatpush3.msra.mxu1 %v604_v49 }
 0xf86   :  { %1023 = vmatprep.subr.mxu1 %v1148_v9 }
 0xf87   :  { %1024 = vmatpush3.msra.mxu1 %v603_v50 }
 0xf88   :  { %1025 = vmatprep.subr.mxu1 %v1148_v9 }
 0xf89   :  { %1026 = vmatpush3.msra.mxu1 %v602_v52 }
 0xf8a   :  { %1027 = vmatprep.subr.mxu1 %v1148_v9 }
 0xf8b   :  { %1028 = vmatpush3.msra.mxu1 %v601_v53 }
 0xf8c   :  { %1029 = vmatprep.subr.mxu1 %v1148_v9 }
 0xf8d   :  { %1030 = vmatpush3.msra.mxu1 %v600_v54 }
 0xf8e   :  { %1031 = vmatprep.subr.mxu1 %v1148_v9 }
 0xf8f   :  { %1032 = vmatpush3.msra.mxu1 %v599_v13 }
 0xf90   :  { %1033 = vmatprep.subr.mxu1 %v1148_v9 }
 0xf91   :  { %1034 = vmatpush3.msra.mxu1 %v598_v55 }
 0xf92   :  { %1035 = vmatprep.subr.mxu1 %v1148_v9 }
 0xf93   :  { %1036 = vmatpush3.msra.mxu1 %v597_v56 }
 0xf94   :  { %1037 = vmatprep.subr.mxu1 %v1148_v9 }
 0xf95   :  { %1038 = vmatpush3.msra.mxu1 %v596_v57 }
 0xf96   :  { %1039 = vmatprep.subr.mxu1 %v1148_v9 }
 0xf97   :  { %1040 = vmatpush3.msra.mxu1 %v595_v58 }
 0xf98   :  { %1041 = vmatprep.subr.mxu1 %v1148_v9 }
 0xf99   :  { %1042 = vmatpush3.msra.mxu1 %v594_v59 }
 0xf9a   :  { %1043 = vmatprep.subr.mxu1 %v1148_v9 }
 0xf9b   :  { %1044 = vmatpush3.msra.mxu1 %v593_v15 }
 0xf9c   :  { %1045 = vmatprep.subr.mxu1 %v1148_v9 }
 0xf9d   :  { %1046 = vmatpush3.msra.mxu1 %v592_v60 }
 0xf9e   :  { %1047 = vmatprep.subr.mxu1 %v1148_v9 }
 0xf9f   :  { %1048 = vmatpush3.msra.mxu1 %v591_v61 }
0x1040   :  { %v464_v6 = vpop.f32.mrf.mxu1 }
0x1041   :  { %v470_v7 = vadd.f32 %v893_v5, %v464_v6 }
0x1042   :  { %v1007_v8 = vpop.f32.mrf.mxu1 }
0x1043   :  { %v895_v10 = vmul.f32 -1.442695, %v470_v7 }
0x1044   :  { %v467_v11 = vpop.f32.mrf.mxu1 }
0x1045   :  { %1131 = vpow2.f32 %v895_v10 }
0x1046   :  { %v1008_v12 = vpop.f32.mrf.mxu1 }
0x1052   :  { %v1132_v14 = vpop.eup %1131 }
0x1053   :  { %v474_v16 = vadd.f32 1.0, %v1132_v14 }
0x1055   :  { %1133 = vrcp.f32 %v474_v16 }
0x1062   :  { %v1134_v17 = vpop.eup %1133 }
0x1063   :  { %v477_v18 = vmul.f32 2.0, %v1134_v17  ;;  %v479_v22 = vmul.f32 %v1134_v17, %v414_v63  ;;  %v685_v63 = vld [vmem:[%s1455_s1 + $0xd0] sm:$0xff] }
0x1065   :  { %v896_v19 = vadd.f32 -1.0, %v477_v18  ;;  %v680_v18 = vld [vmem:[%s1455_s1 + $0xa8] sm:$0xff] }
0x1067   :  { %481 = vrot.lane.b32.xlu0 %v896_v19, %s1147_s14  ;;  %v679_v19 = vld [vmem:[%s1455_s1 + $0xa0] sm:$0xff] }
0x10d9   :  { %v482_v20 = vpop.permute.xlu0 %481 }
0x10da   :  { %v484_v21 = vmul.f32 %v1134_v17, %v482_v20  ;;  %v607_v20 = vld [vmem:[%s1456_s2] sm:$0xf] }
0x10dc   :  { %486 = vrot.lane.b32.xlu1 %v484_v21, %s1151_s24 }
0x114e   :  { %v487_v23 = vpop.permute.xlu1 %486 }
0x114f   :  { %v489_v24 = vadd.f32 %v487_v23, %v479_v22 }
0x1151   :  { %1135 = vtanh.f32 %v489_v24 }
0x115e   :  { %v1136_v25 = vpop.eup %1135 }
0x115f   :  { %492 = vrot.lane.b32.xlu0 %v1136_v25, %s1147_s14  ;;  %v773_v25 = vld [vmem:[%s1455_s1 + $0x118] sm:$0xff] }
0x11d1   :  { %v493_v26 = vpop.permute.xlu0 %492 }
0x11d2   :  { %v495_v27 = vmul.f32 %v1134_v17, %v493_v26  ;;  %v681_v17 = vld [vmem:[%s1455_s1 + $0xb0] sm:$0xff] }
0x11d3   :  { %v772_v26 = vld [vmem:[%s1455_s1 + $0x110] sm:$0xff] }
0x11d4   :  { %v498_v28 = vpack.c.bf16 %v495_v27, %v495_v27  ;;  %v771_v27 = vld [vmem:[%s1455_s1 + $0x108] sm:$0xff] }
0x11d6   :  { %500 = vrot.lane.b32.xlu1 %v498_v28, %s1151_s24  ;;  %v770_v28 = vld [vmem:[%s1455_s1 + $0x100] sm:$0xff] }
0x1248   :  { %v501_v29 = vpop.permute.xlu1 %500 }
0x1249   :  { %1014 = vmatmul.mubr.msk.bf16.vlgmr.msra.gmra.mxu0 %vm47_vm1, %v501_v29  ;;  %v769_v29 = vld [vmem:[%s1455_s1 + $0xf8] sm:$0xff] }
0x124a   :  { %1068 = vmatprep.mubr.msk.f32.mxu0 %vm1149_vm0, %v1148_v9  ;;  %1053 = vmatpush3.msra.mxu0 %v686_v62 }
0x124b   :  { %1054 = vmatprep.subr.mxu0 %v1148_v9 }
0x124c   :  { %1055 = vmatpush3.msra.mxu0 %v685_v63 }
0x124d   :  { %1056 = vmatprep.subr.mxu0 %v1148_v9 }
0x124e   :  { %1057 = vmatpush3.msra.mxu0 %v684_v0 }
0x124f   :  { %1058 = vmatprep.subr.mxu0 %v1148_v9 }
0x1250   :  { %1059 = vmatpush3.msra.mxu0 %v683_v2 }
0x1251   :  { %1060 = vmatprep.subr.mxu0 %v1148_v9 }
0x1252   :  { %1061 = vmatpush3.msra.mxu0 %v682_v4 }
0x1253   :  { %1062 = vmatprep.subr.mxu0 %v1148_v9 }
0x1254   :  { %1063 = vmatpush3.msra.mxu0 %v681_v17 }
0x1255   :  { %1064 = vmatprep.subr.mxu0 %v1148_v9 }
0x1256   :  { %1065 = vmatpush3.msra.mxu0 %v680_v18 }
0x1257   :  { %1066 = vmatprep.subr.mxu0 %v1148_v9 }
0x1258   :  { %1067 = vmatpush3.msra.mxu0 %v679_v19 }
0x1259   :  { %1071 = vmatprep.subr.mxu0 %v1148_v9 }
0x1309   :  { %v539_v31 = vpop.f32.mrf.mxu0 }
0x130a   :  { %v545_v32 = vadd.f32 %v897_v30, %v539_v31  ;;  %v768_v30 = vld [vmem:[%s1455_s1 + $0xf0] sm:$0xff]  ;;  %v767_v31 = vld [vmem:[%s1455_s1 + $0xe8] sm:$0xff] }
0x130b   :  { %v1015_v33 = vpop.f32.mrf.mxu0 }
0x130c   :  { %v899_v34 = vmul.f32 -1.442695, %v545_v32  ;;  %v766_v32 = vld [vmem:[%s1455_s1 + $0xe0] sm:$0xff] }
0x130d   :  { %v542_v35 = vpop.f32.mrf.mxu0  ;;  %v901_v33 = vld [vmem:[%s1455_s1 + $0x120] ss:$0 sm:$0xff] }
0x130e   :  { %1137 = vpow2.f32 %v899_v34 }
0x130f   :  { %v1016_v36 = vpop.f32.mrf.mxu0 }
0x131b   :  { %v1138_v37 = vpop.eup %1137 }
0x131c   :  { %v549_v38 = vadd.f32 1.0, %v1138_v37 }
0x131e   :  { %1139 = vrcp.f32 %v549_v38  ;;  %v903_v38 = vld [vmem:[%s1455_s1 + $0x128] ss:$0 sm:$0xff] }
0x132b   :  { %v1295_v39 = vpop.eup %1139 }
0x132c   :  { %v552_v40 = vmul.f32 2.0, %v1295_v39  ;;  %v554_v44 = vmul.f32 %v1295_v39, %v489_v24 }
0x132e   :  { %v900_v41 = vadd.f32 -1.0, %v552_v40 }
0x1330   :  { %556 = vrot.lane.b32.xlu0 %v900_v41, %s1147_s14 }
0x13a2   :  { %v557_v42 = vpop.permute.xlu0 %556 }
0x13a3   :  { %v559_v43 = vmul.f32 %v1295_v39, %v557_v42 }
0x13a5   :  { %561 = vrot.lane.b32.xlu1 %v559_v43, %s1151_s24 }
0x1417   :  { %v562_v45 = vpop.permute.xlu1 %561 }
0x1418   :  { %v564_v46 = vadd.f32 %v562_v45, %v554_v44 }
0x141a   :  { %1141 = vtanh.f32 %v564_v46 }
0x1427   :  { %v1142_v51 = vpop.eup %1141 }
0x1428   :  { %567 = vrot.lane.b32.xlu0 %v1142_v51, %s1147_s14 }
0x149a   :  { %v568_v1 = vpop.permute.xlu0 %567 }
0x149b   :  { %v570_v3 = vmul.f32 %v1295_v39, %v568_v1 }
0x149d   :  { %576 = vrot.lane.b32.xlu1 %v570_v3, %s1151_s24  ;;  %v572_v5 = vrot.slane %v570_v3, 4 }
0x149f   :  { %579 = vrot.lane.b32.xlu0 %v572_v5, %s1147_s14  ;;  %v574_v6 = vsub.f32 %v570_v3, %v572_v5  ;;  %v575_v7 = vmul.f32 %v572_v5, %v570_v3 }
0x14a1   :  { %583 = vrot.lane.b32.xlu1 %v574_v6, %s1150_s23 }
0x150f   :  { %v577_v8 = vpop.permute.xlu1 %576 }
0x1511   :  { %v580_v10 = vpop.permute.xlu0 %579 }
0x1512   :  { %v586_v11 = vsel %vm47_vm1, %v577_v8, %v580_v10 }
0x1513   :  { %v584_v12 = vpop.permute.xlu1 %583 }
0x1514   :  { %v588_v14 = vsel %vm587_vm2, %v586_v11, %v584_v12 }
0x1515   :  { %v590_v16 = vsel %vm589_vm3, %v588_v14, %v575_v7 }
0x1516   :  { %1050 = vmatmul.mubr.f32.vlgmr.msra.gmra.mxu1 %v590_v16 }
0x15d6   :  { %v674_v21 = vpop.f32.mrf.mxu1 }
0x15d7   :  { %v675_v22 = vadd.f32 %v674_v21, %v607_v20 }
0x15d8   :  { %v1051_v23 = vpop.f32.mrf.mxu1 }
0x15d9   :  { %v678_v24 = vmax.f32 %v675_v22, 0.0 }
0x15db   :  { %1069 = vmatmul.mubr.msk.f32.vlgmr.msra.gmra.mxu0 %vm587_vm2, %v678_v24 }
0x15dc   :  { %1072 = vmatpush3.msra.mxu0 %v773_v25  ;;  %1087 = vmatprep.mubr.msk.f32.mxu0 %vm1149_vm0, %v1148_v9 }
0x15dd   :  { %1073 = vmatprep.subr.mxu0 %v1148_v9 }
0x15de   :  { %1074 = vmatpush3.msra.mxu0 %v772_v26 }
0x15df   :  { %1075 = vmatprep.subr.mxu0 %v1148_v9 }
0x15e0   :  { %1076 = vmatpush3.msra.mxu0 %v771_v27 }
0x15e1   :  { %1077 = vmatprep.subr.mxu0 %v1148_v9 }
0x15e2   :  { %1078 = vmatpush3.msra.mxu0 %v770_v28 }
0x15e3   :  { %1079 = vmatprep.subr.mxu0 %v1148_v9 }
0x15e4   :  { %1080 = vmatpush3.msra.mxu0 %v769_v29 }
0x15e5   :  { %1081 = vmatprep.subr.mxu0 %v1148_v9 }
0x15e6   :  { %1082 = vmatpush3.msra.mxu0 %v768_v30 }
0x15e7   :  { %1083 = vmatprep.subr.mxu0 %v1148_v9 }
0x15e8   :  { %1084 = vmatpush3.msra.mxu0 %v767_v31 }
0x15e9   :  { %1085 = vmatprep.subr.mxu0 %v1148_v9 }
0x15ea   :  { %1086 = vmatpush3.msra.mxu0 %v766_v32 }
0x169b   :  { %v761_v34 = vpop.f32.mrf.mxu0 }
0x169c   :  { %v762_v35 = vadd.f32 %v901_v33, %v761_v34 }
0x169d   :  { %v1070_v36 = vpop.f32.mrf.mxu0 }
0x169e   :  { %v765_v37 = vmax.f32 %v762_v35, 0.0 }
0x16a0   :  { %1088 = vmatmul.mubr.msk.f32.vlgmr.msra.gmra.mxu0 %vm587_vm2, %v765_v37 }
0x1760   :  { %v848_v9 = vpop.f32.mrf.mxu0 }
0x1761   :  { %v849_v39 = vadd.f32 %v903_v38, %v848_v9 }
0x1762   :  { %v1089_v40 = vpop.f32.mrf.mxu0 }
0x1763   :  { %v853_v41 = vsel %vm852_vm4, %v849_v39, -inf }
0x1764   :  { %854 = vmax.xlane.f32.xlu0 %v853_v41 }
0x17ed   :  { %v855_v42 = vpop.xlane.xlu0 %854 }
0x17ee   :  { %v856_v43 = vsub.f32 %v849_v39, %v855_v42 }
0x17f0   :  { %v857_v44 = vmul.f32 1.442695, %v856_v43 }
0x17f2   :  { %1143 = vpow2.f32 %v857_v44 }
0x17ff   :  { %v1144_v45 = vpop.eup %1143 }
0x1800   :  { %v859_v46 = vsel %vm852_vm4, %v1144_v45, 0.0 }
0x1801   :  { %860 = vadd.xlane.f32.xlu1 %v859_v46 }
0x188a   :  { %v861_v47 = vpop.xlane.xlu1 %860 }
0x188b   :  { %1145 = vlog2.f32 %v861_v47 }
0x1898   :  { %v1146_v48 = vpop.eup %1145 }
0x1899   :  { %v863_v49 = vmul.f32 0.6931472, %v1146_v48 }
0x189b   :  { %v864_v50 = vadd.f32 %v863_v49, %v855_v42 }
0x189d   :  { %v865_v51 = vsub.f32 %v849_v39, %v864_v50 }
0x189f   :  { %866 = vst.msk [vmem:[%s1457_s3] sm:$0xf] %vm852_vm4, %v865_v51 }

</bundles_post_ra>
